<compile_context>
chip_gen: v5e
topology: v5e:2x2
jax: 0.10.0
libtpu: 0.0.40
codegen_flags: <defaults>
</compile_context>

<pallas_src>
import functools
import math

import jax
import jax.numpy as jnp
from jax import lax
from jax.experimental import pallas as pl
from jax.experimental.pallas import tpu as pltpu


_VMEM_BUDGET_BYTES = 16 * 1024 * 1024   # explicit input/accumulator buffers
_VMEM_LIMIT_BYTES = 48 * 1024 * 1024    # scoped VMEM limit (> v5e default, < v7x physical)


def _mse_kernel(pred_ref, label_ref, out_ref, acc_ref, *, ncols, tile_n,
                tiles_per_chunk):
    """pred_ref/label_ref: (R, tile_n) blocks of the flat (R, ncols) inputs.
    out_ref: (1, R, 128) per-chunk partial sums (lane-broadcast).
    acc_ref: (R, tile_n) f32 running sum of squared differences."""
    chunk = pl.program_id(0)           # parallel chunk (megacore axis on v7x)
    r = pl.program_id(1)               # tile within chunk (reduction axis)

    @pl.when(r == 0)
    def _init():
        acc_ref[...] = jnp.zeros_like(acc_ref)

    # Cast to f32 inside the kernel (inputs may be bf16); pure VPU work.
    diff = pred_ref[...].astype(jnp.float32) - label_ref[...].astype(jnp.float32)
    sq = diff * diff

    t = chunk * tiles_per_chunk + r    # logical tile id along the flat axis
    lim = ncols - t * tile_n           # number of valid columns in this tile

    @pl.when(lim >= tile_n)            # interior tile: no masking needed
    def _interior():
        acc_ref[...] += sq

    @pl.when(lim < tile_n)             # ragged edge tile (or clamped duplicate)
    def _edge():
        col = lax.broadcasted_iota(jnp.int32, sq.shape, 1)
        acc_ref[...] += jnp.where(col < lim, sq, 0.0)   # select, not multiply

    @pl.when(r == pl.num_programs(1) - 1)
    def _finalize():
        tot = jnp.sum(acc_ref[...], axis=1, keepdims=True)      # (R, 1)
        out_ref[0] = jnp.broadcast_to(tot, out_ref.shape[1:])   # (R, 128)


def _row_split(batch, n, min_itemsize):
    """Largest power-of-two divisor S of n such that batch*S fills the
    sublanes of one vreg (8 rows for 4-byte dtypes, 16 for 2-byte)."""
    pack = max(8, 32 // max(min_itemsize, 1))
    s = 1
    while batch * s < pack and n % (s * 2) == 0:
        s *= 2
    return s


def _padded_rows(rows, itemsize):
    pack = max(8, 32 // max(itemsize, 1))
    return -(-rows // pack) * pack


def mse_loss(pred, label, max_tile_cols=None):
    """pred: (B, ...); label: any shape with the same number of elements.
    Returns per-batch mean squared error, shape (B,), float32.
    max_tile_cols is a testing hook to force the tiled/masked path at small n."""
    B = pred.shape[0]
    n = math.prod(pred.shape[1:])
    label = jnp.reshape(label, pred.shape)            # label.view(pred.size())

    isz_p = jnp.dtype(pred.dtype).itemsize
    isz_l = jnp.dtype(label.dtype).itemsize

    # Free row-major reshape (no pad, no copy): (B, ...) -> (R, NC).
    S = _row_split(B, n, min(isz_p, isz_l))
    R = B * S
    NC = n // S
    p2 = pred.reshape(R, NC)
    l2 = label.reshape(R, NC)

    # Tile width from a VMEM byte budget: 2 inputs x 2 pipeline buffers + acc.
    bytes_per_col = (2 * (_padded_rows(R, isz_p) * isz_p
                          + _padded_rows(R, isz_l) * isz_l)
                     + _padded_rows(R, 4) * 4)
    cols = max(_VMEM_BUDGET_BYTES // bytes_per_col, 128)
    if max_tile_cols is not None:
        cols = max(min(cols, max_tile_cols), 128)
    cols = (cols // 512) * 512 if cols >= 512 else (cols // 128) * 128
    tile_n = min(cols, NC)

    total_tiles = -(-NC // tile_n)
    num_chunks = 2 if total_tiles >= 2 else 1         # megacore split (v7x)
    tiles_per_chunk = -(-total_tiles // num_chunks)

    def in_map(p, r):
        # Clamp so a duplicated trailing step stays in bounds; its
        # contribution is masked to zero inside the kernel.
        return (0, jnp.minimum(p * tiles_per_chunk + r, total_tiles - 1))

    kernel = functools.partial(_mse_kernel, ncols=NC, tile_n=tile_n,
                               tiles_per_chunk=tiles_per_chunk)

    grid_spec = pltpu.PrefetchScalarGridSpec(
        num_scalar_prefetch=0,
        grid=(num_chunks, tiles_per_chunk),
        in_specs=[
            pl.BlockSpec((R, tile_n), in_map),
            pl.BlockSpec((R, tile_n), in_map),
        ],
        out_specs=pl.BlockSpec((1, R, 128), lambda p, r: (p, 0, 0)),
        scratch_shapes=[pltpu.VMEM((R, tile_n), jnp.float32)],
    )

    cost = pl.CostEstimate(
        flops=3 * B * n,                               # sub + mul + add per element
        transcendentals=0,
        bytes_accessed=B * n * (isz_p + isz_l) + num_chunks * R * 128 * 4,
    )

    partials = pl.pallas_call(
        kernel,
        out_shape=jax.ShapeDtypeStruct((num_chunks, R, 128), jnp.float32),
        grid_spec=grid_spec,
        compiler_params=pltpu.CompilerParams(
            dimension_semantics=("parallel", "arbitrary"),
            vmem_limit_bytes=_VMEM_LIMIT_BYTES,
        ),
        cost_estimate=cost,
    )(p2, l2)

    per_row = jnp.sum(partials[:, :, 0], axis=0)       # (R,)
    return per_row.reshape(B, S).sum(axis=1) * (1.0 / float(n))


def _reference(pred, label):
    label = jnp.reshape(label, pred.shape)
    diff = pred.astype(jnp.float32) - label.astype(jnp.float32)
    axes = tuple(range(1, pred.ndim))
    return jnp.mean(diff * diff, axis=axes)


if __name__ == "__main__":
    key = jax.random.PRNGKey(0)
    k1, k2 = jax.random.split(key)

    B, C, H, W = 2, 4, 16, 16
    pred = jax.random.normal(k1, (B, C, H, W), dtype=jnp.float32)
    label = jax.random.normal(k2, (B, C, H, W), dtype=jnp.float32)

    out = jax.block_until_ready(mse_loss(pred, label))
    ref = _reference(pred, label)
    if not jnp.allclose(out, ref, rtol=1e-5, atol=1e-5):
        raise AssertionError(f"f32 mismatch: kernel={out} ref={ref}")

    # bf16 path: inputs stay bf16 across the DMA, cast to f32 inside the kernel.
    pred_bf = pred.astype(jnp.bfloat16)
    label_bf = label.astype(jnp.bfloat16)
    out_bf = jax.block_until_ready(mse_loss(pred_bf, label_bf))
    ref_bf = _reference(pred_bf, label_bf)
    if not jnp.allclose(out_bf, ref_bf, rtol=1e-4, atol=1e-4):
        raise AssertionError(f"bf16 mismatch: kernel={out_bf} ref={ref_bf}")

    # Multi-tile / masked-edge / 2-chunk path (odd tile count exercises the
    # clamped duplicate step), forced at a small shape via max_tile_cols.
    k3, k4 = jax.random.split(k1)
    pred_r = jax.random.normal(k3, (2, 3, 20, 20), dtype=jnp.float32)   # n=1200
    label_r = jax.random.normal(k4, (2, 3, 20, 20), dtype=jnp.float32)
    out_r = jax.block_until_ready(mse_loss(pred_r, label_r, max_tile_cols=128))
    ref_r = _reference(pred_r, label_r)
    if not jnp.allclose(out_r, ref_r, rtol=1e-5, atol=1e-5):
        raise AssertionError(f"ragged mismatch: kernel={out_r} ref={ref_r}")

    print("KERNEL_OK")
</pallas_src>

<mosaic_0001>
module attributes {stable_mosaic.version = 11 : i64} {
  func.func @_mse_kernel(%arg0: i32, %arg1: i32, %arg2: memref<8x256xf32, #tpu.memory_space<vmem>>, %arg3: memref<8x256xf32, #tpu.memory_space<vmem>>, %arg4: memref<1x8x128xf32, #tpu.memory_space<vmem>>, %arg5: memref<8x256xf32, #tpu.memory_space<vmem>>) attributes {dimension_semantics = [#tpu.dimension_semantics<parallel>, #tpu.dimension_semantics<arbitrary>], iteration_bounds = array<i64: 1, 1>, scalar_prefetch = 0 : i64, scratch_operands = 1 : i64, tpu.core_type = #tpu.core_type<tc>, window_params = [{transform_indices = @transform_0, window_bounds = array<i64: 8, 256>}, {transform_indices = @transform_1, window_bounds = array<i64: 8, 256>}, {transform_indices = @transform_2, window_bounds = array<i64: 1, 8, 128>}]} {
    %c0_i32 = arith.constant 0 : i32
    %0 = arith.cmpi eq, %arg1, %c0_i32 : i32
    %1 = arith.extui %0 : i1 to i32
    %c0_i32_0 = arith.constant 0 : i32
    %2 = arith.cmpi ne, %1, %c0_i32_0 : i32
    scf.if %2 {
      %cst = arith.constant 0.000000e+00 : f32
      %20 = vector.broadcast %cst : f32 to vector<8x256xf32>
      %c0_11 = arith.constant 0 : index
      %c0_12 = arith.constant 0 : index
      %21 = vector.load %arg5[%c0_11, %c0_12] : memref<8x256xf32, #tpu.memory_space<vmem>>, vector<8x256xf32>
      tpu.vector_store %arg5[%c0_11, %c0_12], %20 {strides = array<i32>} : memref<8x256xf32, #tpu.memory_space<vmem>>, vector<8x256xf32>,
    } else {
    }
    %c0 = arith.constant 0 : index
    %c0_1 = arith.constant 0 : index
    %3 = vector.load %arg2[%c0, %c0_1] : memref<8x256xf32, #tpu.memory_space<vmem>>, vector<8x256xf32>
    %c0_2 = arith.constant 0 : index
    %c0_3 = arith.constant 0 : index
    %4 = vector.load %arg3[%c0_2, %c0_3] : memref<8x256xf32, #tpu.memory_space<vmem>>, vector<8x256xf32>
    %5 = arith.subf %3, %4 : vector<8x256xf32>
    %6 = arith.mulf %5, %5 : vector<8x256xf32>
    %c1_i32 = arith.constant 1 : i32
    %7 = arith.muli %arg0, %c1_i32 : i32
    %8 = arith.addi %7, %arg1 : i32
    %c256_i32 = arith.constant 256 : i32
    %9 = arith.muli %8, %c256_i32 : i32
    %c256_i32_4 = arith.constant 256 : i32
    %10 = arith.subi %c256_i32_4, %9 : i32
    %c256_i32_5 = arith.constant 256 : i32
    %11 = arith.cmpi sge, %10, %c256_i32_5 : i32
    %12 = arith.extui %11 : i1 to i32
    %c0_i32_6 = arith.constant 0 : i32
    %13 = arith.cmpi ne, %12, %c0_i32_6 : i32
    scf.if %13 {
      %c0_11 = arith.constant 0 : index
      %c0_12 = arith.constant 0 : index
      %20 = vector.load %arg5[%c0_11, %c0_12] : memref<8x256xf32, #tpu.memory_space<vmem>>, vector<8x256xf32>
      %21 = arith.addf %20, %6 : vector<8x256xf32>
      %c0_13 = arith.constant 0 : index
      %c0_14 = arith.constant 0 : index
      %22 = vector.load %arg5[%c0_13, %c0_14] : memref<8x256xf32, #tpu.memory_space<vmem>>, vector<8x256xf32>
      tpu.vector_store %arg5[%c0_13, %c0_14], %21 {strides = array<i32>} : memref<8x256xf32, #tpu.memory_space<vmem>>, vector<8x256xf32>,
    } else {
    }
    %c256_i32_7 = arith.constant 256 : i32
    %14 = arith.cmpi slt, %10, %c256_i32_7 : i32
    %15 = arith.extui %14 : i1 to i32
    %c0_i32_8 = arith.constant 0 : i32
    %16 = arith.cmpi ne, %15, %c0_i32_8 : i32
    scf.if %16 {
      %20 = tpu.iota {dimensions = array<i32: 1>} : vector<8x256xi32>
      %c0_11 = arith.constant 0 : index
      %c0_12 = arith.constant 0 : index
      %21 = vector.load %arg5[%c0_11, %c0_12] : memref<8x256xf32, #tpu.memory_space<vmem>>, vector<8x256xf32>
      %22 = vector.broadcast %10 : i32 to vector<8x256xi32>
      %23 = arith.cmpi slt, %20, %22 : vector<8x256xi32>
      %cst = arith.constant 0.000000e+00 : f32
      %24 = vector.broadcast %cst : f32 to vector<8x256xf32>
      %25 = arith.select %23, %6, %24 : vector<8x256xi1>, vector<8x256xf32>
      %26 = arith.addf %21, %25 : vector<8x256xf32>
      %c0_13 = arith.constant 0 : index
      %c0_14 = arith.constant 0 : index
      %27 = vector.load %arg5[%c0_13, %c0_14] : memref<8x256xf32, #tpu.memory_space<vmem>>, vector<8x256xf32>
      tpu.vector_store %arg5[%c0_13, %c0_14], %26 {strides = array<i32>} : memref<8x256xf32, #tpu.memory_space<vmem>>, vector<8x256xf32>,
    } else {
    }
    %c0_i32_9 = arith.constant 0 : i32
    %17 = arith.cmpi eq, %arg1, %c0_i32_9 : i32
    %18 = arith.extui %17 : i1 to i32
    %c0_i32_10 = arith.constant 0 : i32
    %19 = arith.cmpi ne, %18, %c0_i32_10 : i32
    scf.if %19 {
      %c0_11 = arith.constant 0 : index
      %c0_12 = arith.constant 0 : index
      %20 = vector.load %arg5[%c0_11, %c0_12] : memref<8x256xf32, #tpu.memory_space<vmem>>, vector<8x256xf32>
      %cst = arith.constant dense<0.000000e+00> : vector<8xf32>
      %21 = vector.multi_reduction <add>, %20, %cst [1] : vector<8x256xf32> to vector<8xf32>
      %22 = vector.shape_cast %21 : vector<8xf32> to vector<8x1xf32>
      %23 = vector.shape_cast %22 : vector<8x1xf32> to vector<8x1xf32>
      %24 = vector.broadcast %23 : vector<8x1xf32> to vector<8x128xf32>
      %c0_13 = arith.constant 0 : index
      %c0_14 = arith.constant 0 : index
      %c0_15 = arith.constant 0 : index
      %25 = vector.load %arg4[%c0_13, %c0_14, %c0_15] : memref<1x8x128xf32, #tpu.memory_space<vmem>>, vector<1x8x128xf32>
      %26 = vector.shape_cast %25 : vector<1x8x128xf32> to vector<8x128xf32>
      %27 = vector.shape_cast %24 : vector<8x128xf32> to vector<1x8x128xf32>
      tpu.vector_store %arg4[%c0_13, %c0_14, %c0_15], %27 {strides = array<i32>} : memref<1x8x128xf32, #tpu.memory_space<vmem>>, vector<1x8x128xf32>,
    } else {
    }
    return
  }
  func.func @transform_0(%arg0: i32, %arg1: i32) -> (i32, i32) {
    %c1_i32 = arith.constant 1 : i32
    %0 = arith.muli %arg0, %c1_i32 : i32
    %1 = arith.addi %0, %arg1 : i32
    %c0_i32 = arith.constant 0 : i32
    %2 = arith.minsi %1, %c0_i32 : i32
    %c0_i32_0 = arith.constant 0 : i32
    %c0_i32_1 = arith.constant 0 : i32
    return %c0_i32_0, %2 : i32, i32
  }
  func.func @transform_1(%arg0: i32, %arg1: i32) -> (i32, i32) {
    %c1_i32 = arith.constant 1 : i32
    %0 = arith.muli %arg0, %c1_i32 : i32
    %1 = arith.addi %0, %arg1 : i32
    %c0_i32 = arith.constant 0 : i32
    %2 = arith.minsi %1, %c0_i32 : i32
    %c0_i32_0 = arith.constant 0 : i32
    %c0_i32_1 = arith.constant 0 : i32
    return %c0_i32_0, %2 : i32, i32
  }
  func.func @transform_2(%arg0: i32, %arg1: i32) -> (i32, i32, i32) {
    %c0_i32 = arith.constant 0 : i32
    %c0_i32_0 = arith.constant 0 : i32
    %c0_i32_1 = arith.constant 0 : i32
    return %arg0, %c0_i32, %c0_i32_0 : i32, i32, i32
  }
}

</mosaic_0001>

<bundles_post_ra>
// kernel: tpu_custom_call.1
= control target key start
LH: loop header
LB: loop body
LE: loop exit
PB: predicated region body
PF: predicated region fallthrough
CT: control target
= control target key end

     0   :  { %7 = vsyncpa [#allocation4], 0  ;;  %s244_s0 = inlined_call_operand.hbm [shape: f32[8,256], index: 0, kind: input, shape index: {}]   ;;  %s245_s1 = inlined_call_operand.hbm [shape: f32[8,256], index: 1, kind: input, shape index: {}]   ;;  %s246_s2 = inlined_call_operand.hbm [shape: f32[1,8,128], index: 2, kind: output, shape index: {}]  }
   0x1   :  { %8 = vsyncpa [#allocation7], 0 }
   0x2   :  { %9 = vsyncpa [#allocation5], 0  ;;  %s21_s11 = sshll.u32 %s244_s0, 4  ;;  %s217_s12 = smov [#allocation3]   ;;  %s22_s11 = int_to_ptr.hbm [resolvable:$true] %s21_s11 }
   0x3   :  { %s23_s13 = sshll.u32 %s217_s12, 4  ;;  %s38_s16 = sshll.u32 %s245_s1, 4  ;;  %s24_s13 = int_to_ptr.vmem [resolvable:$true] %s23_s13  ;;  %s39_s16 = int_to_ptr.hbm [resolvable:$true] %s38_s16 }
   0x4   :  { %26 = dma.hbm_to_vmem [thread:$0]  %s22_s11, 256, %s24_s13, [#allocation4]  }
   0x5   :  { %s218_s17 = smov [#allocation6]  }
   0x6   :  { %s40_s18 = sshll.u32 %s218_s17, 4  ;;  %s41_s18 = int_to_ptr.vmem [resolvable:$true] %s40_s18 }
   0x7   :  { %43 = dma.hbm_to_vmem [thread:$0]  %s39_s16, 256, %s41_s18, [#allocation7]  }
   0x8   :  { %211 = dma.done.wait [#allocation4], 256  }
   0x9   :  { %212 = vsyncadd [#allocation4], 4294967040 }
   0xa   :  { %213 = dma.done.wait [#allocation7], 256  }
   0xb   :  { %214 = vsyncadd [#allocation7], 4294967040  ;;  %v66_v0 = vld [vmem:[#allocation3] sm:$0xff]  ;;  %v67_v1 = vld [vmem:[#allocation3 + $0x8] sm:$0xff]  ;;  %s219_s0 = smov [#allocation8]   ;;  %s121_s21 = sshll.u32 %s246_s2, 4  ;;  %s122_s21 = int_to_ptr.hbm [resolvable:$true] %s121_s21 }
   0xc   :  { %v68_v2 = vld [vmem:[#allocation6] sm:$0xff]  ;;  %v69_v3 = vld [vmem:[#allocation6 + $0x8] sm:$0xff]  ;;  %s119_s1 = sshll.u32 %s219_s0, 4  ;;  %s120_s1 = int_to_ptr.vmem [resolvable:$true] %s119_s1 }
   0xd   :  { %v70_v4 = vsub.f32 %v66_v0, %v68_v2  ;;  %v71_v5 = vsub.f32 %v67_v1, %v69_v3 }
   0xf   :  { %v72_v6 = vmul.f32 %v70_v4, %v70_v4  ;;  %v73_v7 = vmul.f32 %v71_v5, %v71_v5 }
  0x11   :  { %v110_v8 = vadd.f32 %v73_v7, %v72_v6 }
  0x13   :  { %111 = vadd.xlane.f32.xlu0 %v110_v8 }
  0x86   :  { %v112_v9 = vpop.xlane.xlu0 %111 }
  0x87   :  { %113 = vst [vmem:[#allocation8] sm:$0xff] %v112_v9 }
  0x88   :  { %124 = dma.vmem_to_hbm [thread:$0]  %s120_s1, 128, %s122_s21, [#allocation5]  }
  0x89   :  { %215 = dma.done.wait [#allocation5], 128  }
  0x8a   :  { %216 = vsyncadd [#allocation5], 4294967168 }
  0x8b   :  { %129 = vsyncpa [#allocation4], 1 }
  0x8c   :  { %130 = vsyncpa [#allocation7], 1 }
  0x8d   :  { %131 = vsyncpa [#allocation5], 1 }

</bundles_post_ra>
